<compile_context>
chip_gen: v7x
topology: tpu7x:2x2x1
jax: 0.10.0
libtpu: 0.0.40
codegen_flags: <defaults>
</compile_context>

<pallas_src>
import math
import functools

import jax
import jax.numpy as jnp
from jax import lax
from jax.experimental import pallas as pl
from jax.experimental.pallas import tpu as pltpu


def _gelu_exact(x):
    # Exact (erf-based) GELU, matching torch.nn.GELU() default.
    # TODO(synk): tanh-approx GELU (EUP path) is a possible perf lever if the
    # model tolerates the numerics change.
    return 0.5 * x * (1.0 + lax.erf(x * (1.0 / math.sqrt(2.0))))


def _round_up(v, m):
    return ((v + m - 1) // m) * m


def _mlp_kernel(x_ref, w1_ref, b1_ref, w2_ref, b2_ref, o_ref, acc_ref):
    # Grid: (M_pad // tm, H_pad // th); axis 1 (hidden dim) is the reduction.
    # x_ref:  (tm, C)      row block of tokens (resident across the h axis)
    # w1_ref: (C, th)      fc1 weight slab for this hidden chunk
    # b1_ref: (1, th)      fc1 bias chunk
    # w2_ref: (th, O_pad)  fc2 weight slab for this hidden chunk
    # b2_ref: (1, O_pad)   fc2 bias (full, lane-padded)
    # o_ref:  (tm, O_pad)
    # acc_ref:(tm, O_pad)  f32 accumulator scratch
    h_idx = pl.program_id(1)

    @pl.when(h_idx == 0)
    def _():
        acc_ref[...] = jnp.zeros_like(acc_ref)

    x = x_ref[...]
    h = jnp.dot(x, w1_ref[...], preferred_element_type=jnp.float32) + b1_ref[...]
    h = _gelu_exact(h)
    # TODO(synk): dropout with drop=0.0 is the identity at inference; omitted.
    acc_ref[...] += jnp.dot(h.astype(w2_ref.dtype), w2_ref[...],
                            preferred_element_type=jnp.float32)

    @pl.when(h_idx == pl.num_programs(1) - 1)
    def _():
        o_ref[...] = (acc_ref[...] + b2_ref[...]).astype(o_ref.dtype)


@functools.partial(jax.jit, static_argnames=("tm", "th"))
def mlp_pallas(x, w1, b1, w2, b2, *, tm=256, th=512):
    """x: (B, N, C). w1: (C, H), b1: (H,), w2: (H, O), b2: (O,).

    Returns (B, N, O). Computation is f32; on v6e/v7x one could cast x/w1/w2 to
    bf16 at this boundary (keeping f32 accumulation) for ~2x MXU throughput.
    """
    B, N, C = x.shape
    H = w1.shape[1]
    O = w2.shape[1]
    M = B * N

    # Effective tiles, clamped for small problems, sublane/lane aligned.
    tm_eff = min(tm, _round_up(M, 8))
    th_eff = min(th, _round_up(H, 128))

    M_pad = _round_up(M, tm_eff)
    H_pad = _round_up(H, th_eff)
    O_pad = _round_up(O, 128)   # lane-dense output stores

    # Zero-padding is exact: padded hidden units have w1-col = b1 = 0, so
    # gelu(0) = 0 contributes nothing; padded rows/cols are sliced off below.
    x2 = x.reshape(M, C)
    if M_pad != M:
        x2 = jnp.pad(x2, ((0, M_pad - M), (0, 0)))
    w1p = jnp.pad(w1, ((0, 0), (0, H_pad - H)))
    b1p = jnp.pad(b1, ((0, H_pad - H),)).reshape(1, H_pad)
    w2p = jnp.pad(w2, ((0, H_pad - H), (0, O_pad - O)))
    b2p = jnp.pad(b2, ((0, O_pad - O),)).reshape(1, O_pad)

    grid = (M_pad // tm_eff, H_pad // th_eff)

    cost = pl.CostEstimate(
        flops=2 * M * C * H + 2 * M * H * O,
        transcendentals=M * H,
        bytes_accessed=4 * (M * C + C * H + H * O + M * O + H + O),
    )

    out2 = pl.pallas_call(
        _mlp_kernel,
        out_shape=jax.ShapeDtypeStruct((M_pad, O_pad), x.dtype),
        grid_spec=pltpu.PrefetchScalarGridSpec(
            num_scalar_prefetch=0,
            grid=grid,
            in_specs=[
                pl.BlockSpec((tm_eff, C), lambda i, j: (i, 0)),        # x rows
                pl.BlockSpec((C, th_eff), lambda i, j: (0, j)),        # fc1 W chunk
                pl.BlockSpec((1, th_eff), lambda i, j: (0, j)),        # fc1 bias chunk
                pl.BlockSpec((th_eff, O_pad), lambda i, j: (j, 0)),    # fc2 W chunk
                pl.BlockSpec((1, O_pad), lambda i, j: (0, 0)),         # fc2 bias
            ],
            out_specs=pl.BlockSpec((tm_eff, O_pad), lambda i, j: (i, 0)),
            scratch_shapes=[pltpu.VMEM((tm_eff, O_pad), jnp.float32)],
        ),
        compiler_params=pltpu.CompilerParams(
            dimension_semantics=("parallel", "arbitrary"),
            vmem_limit_bytes=48 * 1024 * 1024,   # fits v7x (64 MiB) with headroom
        ),
        cost_estimate=cost,
    )(x2, w1p, b1p, w2p, b2p)

    return out2[:M, :O].reshape(B, N, O)


def mlp_reference(x, w1, b1, w2, b2):
    h = jnp.dot(x, w1) + b1
    h = _gelu_exact(h)
    return jnp.dot(h, w2) + b2


if __name__ == "__main__":
    key = jax.random.PRNGKey(0)
    B, N = 2, 8                 # batch, tokens
    in_features = 32
    hidden_features = 64
    out_features = 32           # defaults to in_features in the module

    kx, k1, kb1, k2, kb2 = jax.random.split(key, 5)
    x = jax.random.normal(kx, (B, N, in_features), dtype=jnp.float32)

    # Deterministic parameter init (uniform like nn.Linear's default bound).
    bound1 = 1.0 / math.sqrt(in_features)
    bound2 = 1.0 / math.sqrt(hidden_features)
    w1 = jax.random.uniform(k1, (in_features, hidden_features),
                            minval=-bound1, maxval=bound1, dtype=jnp.float32)
    b1 = jax.random.uniform(kb1, (hidden_features,),
                            minval=-bound1, maxval=bound1, dtype=jnp.float32)
    w2 = jax.random.uniform(k2, (hidden_features, out_features),
                            minval=-bound2, maxval=bound2, dtype=jnp.float32)
    b2 = jax.random.uniform(kb2, (out_features,),
                            minval=-bound2, maxval=bound2, dtype=jnp.float32)

    out = mlp_pallas(x, w1, b1, w2, b2)
    out = jax.block_until_ready(out)

    ref = mlp_reference(x, w1, b1, w2, b2)
    assert out.shape == (B, N, out_features)
    assert jnp.allclose(out, ref, atol=1e-5, rtol=1e-5), "mismatch vs reference"

    print("KERNEL_OK")
</pallas_src>

<mosaic_0001>
module attributes {stable_mosaic.version = 11 : i64} {
  func.func @_mlp_kernel(%arg0: i32, %arg1: i32, %arg2: memref<16x32xf32, #tpu.memory_space<vmem>>, %arg3: memref<32x128xf32, #tpu.memory_space<vmem>>, %arg4: memref<1x128xf32, #tpu.memory_space<vmem>>, %arg5: memref<128x128xf32, #tpu.memory_space<vmem>>, %arg6: memref<1x128xf32, #tpu.memory_space<vmem>>, %arg7: memref<16x128xf32, #tpu.memory_space<vmem>>, %arg8: memref<16x128xf32, #tpu.memory_space<vmem>>) attributes {dimension_semantics = [#tpu.dimension_semantics<parallel>, #tpu.dimension_semantics<arbitrary>], iteration_bounds = array<i64: 1, 1>, scalar_prefetch = 0 : i64, scratch_operands = 1 : i64, tpu.core_type = #tpu.core_type<tc>, window_params = [{transform_indices = @transform_0, window_bounds = array<i64: 16, 32>}, {transform_indices = @transform_1, window_bounds = array<i64: 32, 128>}, {transform_indices = @transform_2, window_bounds = array<i64: 1, 128>}, {transform_indices = @transform_3, window_bounds = array<i64: 128, 128>}, {pipeline_mode = #tpu.pipeline_mode<synchronous>, transform_indices = @transform_4, window_bounds = array<i64: 1, 128>}, {transform_indices = @transform_5, window_bounds = array<i64: 16, 128>}]} {
    %c0_i32 = arith.constant 0 : i32
    %0 = arith.cmpi eq, %arg1, %c0_i32 : i32
    %1 = arith.extui %0 : i1 to i32
    %c0_i32_0 = arith.constant 0 : i32
    %2 = arith.cmpi ne, %1, %c0_i32_0 : i32
    scf.if %2 {
      %cst_18 = arith.constant 0.000000e+00 : f32
      %25 = vector.broadcast %cst_18 : f32 to vector<16x128xf32>
      %c0_19 = arith.constant 0 : index
      %c0_20 = arith.constant 0 : index
      %26 = vector.load %arg8[%c0_19, %c0_20] : memref<16x128xf32, #tpu.memory_space<vmem>>, vector<16x128xf32>
      tpu.vector_store %arg8[%c0_19, %c0_20], %25 {strides = array<i32>} : memref<16x128xf32, #tpu.memory_space<vmem>>, vector<16x128xf32>,
    } else {
    }
    %c0 = arith.constant 0 : index
    %c0_1 = arith.constant 0 : index
    %3 = vector.load %arg2[%c0, %c0_1] : memref<16x32xf32, #tpu.memory_space<vmem>>, vector<16x32xf32>
    %c0_2 = arith.constant 0 : index
    %c0_3 = arith.constant 0 : index
    %4 = vector.load %arg3[%c0_2, %c0_3] : memref<32x128xf32, #tpu.memory_space<vmem>>, vector<32x128xf32>
    %cst = arith.constant dense<0.000000e+00> : vector<16x128xf32>
    %5 = tpu.matmul %3, %4, %cst {dimension_numbers = #tpu.dot_dimension_numbers<[1], [0], [0], [1], [0, 0, 1, 1], [], []>} : vector<16x32xf32>, vector<32x128xf32>, vector<16x128xf32> -> vector<16x128xf32>
    %c0_4 = arith.constant 0 : index
    %c0_5 = arith.constant 0 : index
    %6 = vector.load %arg4[%c0_4, %c0_5] : memref<1x128xf32, #tpu.memory_space<vmem>>, vector<1x128xf32>
    %7 = vector.broadcast %6 : vector<1x128xf32> to vector<16x128xf32>
    %8 = arith.addf %5, %7 : vector<16x128xf32>
    %cst_6 = arith.constant 5.000000e-01 : f32
    %9 = vector.broadcast %cst_6 : f32 to vector<16x128xf32>
    %10 = arith.mulf %9, %8 : vector<16x128xf32>
    %cst_7 = arith.constant 0.707106769 : f32
    %11 = vector.broadcast %cst_7 : f32 to vector<16x128xf32>
    %12 = arith.mulf %8, %11 : vector<16x128xf32>
    %13 = math.erf %12 : vector<16x128xf32>
    %cst_8 = arith.constant 1.000000e+00 : f32
    %14 = vector.broadcast %cst_8 : f32 to vector<16x128xf32>
    %15 = arith.addf %14, %13 : vector<16x128xf32>
    %16 = arith.mulf %10, %15 : vector<16x128xf32>
    %c0_9 = arith.constant 0 : index
    %c0_10 = arith.constant 0 : index
    %17 = vector.load %arg8[%c0_9, %c0_10] : memref<16x128xf32, #tpu.memory_space<vmem>>, vector<16x128xf32>
    %c0_11 = arith.constant 0 : index
    %c0_12 = arith.constant 0 : index
    %18 = vector.load %arg5[%c0_11, %c0_12] : memref<128x128xf32, #tpu.memory_space<vmem>>, vector<128x128xf32>
    %cst_13 = arith.constant dense<0.000000e+00> : vector<16x128xf32>
    %19 = tpu.matmul %16, %18, %cst_13 {dimension_numbers = #tpu.dot_dimension_numbers<[1], [0], [0], [1], [0, 0, 1, 1], [], []>} : vector<16x128xf32>, vector<128x128xf32>, vector<16x128xf32> -> vector<16x128xf32>
    %20 = arith.addf %17, %19 : vector<16x128xf32>
    %c0_14 = arith.constant 0 : index
    %c0_15 = arith.constant 0 : index
    %21 = vector.load %arg8[%c0_14, %c0_15] : memref<16x128xf32, #tpu.memory_space<vmem>>, vector<16x128xf32>
    tpu.vector_store %arg8[%c0_14, %c0_15], %20 {strides = array<i32>} : memref<16x128xf32, #tpu.memory_space<vmem>>, vector<16x128xf32>,
    %c0_i32_16 = arith.constant 0 : i32
    %22 = arith.cmpi eq, %arg1, %c0_i32_16 : i32
    %23 = arith.extui %22 : i1 to i32
    %c0_i32_17 = arith.constant 0 : i32
    %24 = arith.cmpi ne, %23, %c0_i32_17 : i32
    scf.if %24 {
      %c0_18 = arith.constant 0 : index
      %c0_19 = arith.constant 0 : index
      %25 = vector.load %arg8[%c0_18, %c0_19] : memref<16x128xf32, #tpu.memory_space<vmem>>, vector<16x128xf32>
      %c0_20 = arith.constant 0 : index
      %c0_21 = arith.constant 0 : index
      %26 = vector.load %arg6[%c0_20, %c0_21] : memref<1x128xf32, #tpu.memory_space<vmem>>, vector<1x128xf32>
      %27 = vector.broadcast %26 : vector<1x128xf32> to vector<16x128xf32>
      %28 = arith.addf %25, %27 : vector<16x128xf32>
      %c0_22 = arith.constant 0 : index
      %c0_23 = arith.constant 0 : index
      %29 = vector.load %arg7[%c0_22, %c0_23] : memref<16x128xf32, #tpu.memory_space<vmem>>, vector<16x128xf32>
      tpu.vector_store %arg7[%c0_22, %c0_23], %28 {strides = array<i32>} : memref<16x128xf32, #tpu.memory_space<vmem>>, vector<16x128xf32>,
    } else {
    }
    return
  }
  func.func @transform_0(%arg0: i32, %arg1: i32) -> (i32, i32) {
    %c0_i32 = arith.constant 0 : i32
    %c0_i32_0 = arith.constant 0 : i32
    return %arg0, %c0_i32 : i32, i32
  }
  func.func @transform_1(%arg0: i32, %arg1: i32) -> (i32, i32) {
    %c0_i32 = arith.constant 0 : i32
    %c0_i32_0 = arith.constant 0 : i32
    return %c0_i32, %arg1 : i32, i32
  }
  func.func @transform_2(%arg0: i32, %arg1: i32) -> (i32, i32) {
    %c0_i32 = arith.constant 0 : i32
    %c0_i32_0 = arith.constant 0 : i32
    return %c0_i32, %arg1 : i32, i32
  }
  func.func @transform_3(%arg0: i32, %arg1: i32) -> (i32, i32) {
    %c0_i32 = arith.constant 0 : i32
    %c0_i32_0 = arith.constant 0 : i32
    return %arg1, %c0_i32 : i32, i32
  }
  func.func @transform_4(%arg0: i32, %arg1: i32) -> (i32, i32) {
    %c0_i32 = arith.constant 0 : i32
    %c0_i32_0 = arith.constant 0 : i32
    %c0_i32_1 = arith.constant 0 : i32
    return %c0_i32, %c0_i32_0 : i32, i32
  }
  func.func @transform_5(%arg0: i32, %arg1: i32) -> (i32, i32) {
    %c0_i32 = arith.constant 0 : i32
    %c0_i32_0 = arith.constant 0 : i32
    return %arg0, %c0_i32 : i32, i32
  }
}

</mosaic_0001>

<bundles_post_ra>
// kernel: mlp_pallas.1
= control target key start
LH: loop header
LB: loop body
LE: loop exit
PB: predicated region body
PF: predicated region fallthrough
CT: control target
= control target key end

     0   :  { %vm39_vm0 = vcmask 261120   ;;  %s476_s1 = inlined_call_operand.vmem [shape: f32[32,128], index: 1, kind: input, shape index: {}]   ;;  %s477_s0 = inlined_call_operand.vmem [shape: f32[16,32], index: 0, kind: input, shape index: {}]   ;;  %s478_s3 = inlined_call_operand.vmem [shape: f32[128,128], index: 3, kind: input, shape index: {}]   ;;  %s479_s2 = inlined_call_operand.vmem [shape: f32[1,128], index: 2, kind: input, shape index: {}]   ;;  %s480_s4 = inlined_call_operand.vmem [shape: f32[1,128], index: 4, kind: input, shape index: {}]   ;;  %s481_s5 = inlined_call_operand.vmem [shape: f32[16,128], index: 5, kind: output, shape index: {}]  }
   0x1   :  { %v28_v0 = vld [vmem:[%s476_s1] sm:$0xff]  ;;  %v29_v1 = vld [vmem:[%s476_s1 + $0x8] sm:$0xff]  ;;  %v30_v2 = vld [vmem:[%s476_s1 + $0x10] sm:$0xff] }
   0x2   :  { %v322_v3 = vpack.c.bf16 %v29_v1, %v28_v0  ;;  %v31_v4 = vld [vmem:[%s476_s1 + $0x18] sm:$0xff]  ;;  %v26_v5 = vld [vmem:[%s477_s0] sm:$0xff]  ;;  %v134_v8 = vld [vmem:[%s478_s3 + $0x8] sm:$0xff] }
   0x3   :  { %v326_v6 = vpack.c.bf16 %v31_v4, %v30_v2  ;;  %284 = vmatprep.mubr.msk.f32.mxu0 %vm39_vm0, %v26_v5  ;;  %v133_v7 = vld [vmem:[%s478_s3] sm:$0xff]  ;;  %v135_v9 = vld [vmem:[%s478_s3 + $0x10] sm:$0xff]  ;;  %v136_v11 = vld [vmem:[%s478_s3 + $0x18] sm:$0xff] }
   0x4   :  { %323 = vmatprep.subr.bf16.mxu0 %v322_v3  ;;  %v330_v10 = vpack.c.bf16 %v134_v8, %v133_v7  ;;  %v334_v12 = vpack.c.bf16 %v136_v11, %v135_v9  ;;  %v137_v13 = vld [vmem:[%s478_s3 + $0x20] sm:$0xff]  ;;  %v138_v14 = vld [vmem:[%s478_s3 + $0x28] sm:$0xff]  ;;  %v139_v17 = vld [vmem:[%s478_s3 + $0x30] sm:$0xff] }
   0x5   :  { %325 = vmatpush3.bf16.msra.mxu0 %v322_v3  ;;  %v338_v15 = vpack.c.bf16 %v138_v14, %v137_v13  ;;  %v27_v16 = vld [vmem:[%s477_s0 + $0x8] sm:$0xff]  ;;  %v140_v18 = vld [vmem:[%s478_s3 + $0x38] sm:$0xff]  ;;  %v141_v20 = vld [vmem:[%s478_s3 + $0x40] sm:$0xff] }
   0x6   :  { %327 = vmatprep.subr.bf16.mxu0 %v326_v6  ;;  %331 = vmatprep.subr.bf16.mxu1 %v330_v10  ;;  %v342_v19 = vpack.c.bf16 %v140_v18, %v139_v17  ;;  %v142_v21 = vld [vmem:[%s478_s3 + $0x48] sm:$0xff]  ;;  %v143_v23 = vld [vmem:[%s478_s3 + $0x50] sm:$0xff]  ;;  %v144_v24 = vld [vmem:[%s478_s3 + $0x58] sm:$0xff] }
   0x7   :  { %333 = vmatpush3.bf16.msra.mxu1 %v330_v10  ;;  %v346_v22 = vpack.c.bf16 %v142_v21, %v141_v20  ;;  %v350_v25 = vpack.c.bf16 %v144_v24, %v143_v23  ;;  %v145_v26 = vld [vmem:[%s478_s3 + $0x60] sm:$0xff]  ;;  %v146_v27 = vld [vmem:[%s478_s3 + $0x68] sm:$0xff]  ;;  %v147_v29 = vld [vmem:[%s478_s3 + $0x70] sm:$0xff] }
   0x8   :  { %335 = vmatprep.subr.bf16.mxu1 %v334_v12  ;;  %v354_v28 = vpack.c.bf16 %v146_v27, %v145_v26  ;;  %v148_v30 = vld [vmem:[%s478_s3 + $0x78] sm:$0xff]  ;;  %v248_v32 = vld [vmem:[%s479_s2] ss:$0 sm:$0xff] }
   0x9   :  { %329 = vmatpush3.bf16.msra.mxu0 %v326_v6  ;;  %v358_v31 = vpack.c.bf16 %v148_v30, %v147_v29  ;;  %v251_v47 = vld [vmem:[%s480_s4] ss:$0 sm:$0xff] }
   0xb   :  { %337 = vmatpush3.bf16.msra.mxu1 %v334_v12 }
   0xc   :  { %285 = vmatmul.mubr.msk.f32.vlgmr.msra.gmra.mrb[0].mxu0 %vm39_vm0, %v27_v16  ;;  %339 = vmatprep.subr.bf16.mxu1 %v338_v15 }
   0xf   :  { %341 = vmatpush3.bf16.msra.mxu1 %v338_v15 }
  0x10   :  { %343 = vmatprep.subr.bf16.mxu1 %v342_v19 }
  0x13   :  { %345 = vmatpush3.bf16.msra.mxu1 %v342_v19 }
  0x14   :  { %347 = vmatprep.subr.bf16.mxu1 %v346_v22 }
  0x17   :  { %349 = vmatpush3.bf16.msra.mxu1 %v346_v22 }
  0x18   :  { %351 = vmatprep.subr.bf16.mxu1 %v350_v25 }
  0x1b   :  { %353 = vmatpush3.bf16.msra.mxu1 %v350_v25 }
  0x1c   :  { %355 = vmatprep.subr.bf16.mxu1 %v354_v28 }
  0x1f   :  { %357 = vmatpush3.bf16.msra.mxu1 %v354_v28 }
  0x20   :  { %359 = vmatprep.subr.bf16.mxu1 %v358_v31 }
  0x23   :  { %361 = vmatpush3.bf16.msra.mxu1 %v358_v31 }
  0xdf   :  { %v286_v33 = vpop.f32.mrb[0].mxu0 }
  0xe0   :  { %v118_v34 = vadd.f32 %v286_v33, %v248_v32  ;;  %v112_v35 = vpop.f32.mrb[1].mxu0 }
  0xe1   :  { %v113_v36 = vadd.f32 %v248_v32, %v112_v35 }
  0xe2   :  { %v124_v37 = vmul.f32 0.70710677, %v118_v34  ;;  %v122_v44 = vmul.f32 0.5, %v118_v34 }
  0xe3   :  { %v123_v38 = vmul.f32 0.70710677, %v113_v36  ;;  %v121_v42 = vmul.f32 0.5, %v113_v36 }
  0xe4   :  { %362 = verf.f32 %v124_v37 }
  0xe5   :  { %364 = verf.f32 %v123_v38 }
  0xee   :  { %v363_v39 = vpop.eup %362 }
  0xef   :  { %v365_v40 = vpop.eup %364  ;;  %v128_v41 = vadd.f32 1.0, %v363_v39 }
  0xf0   :  { %v127_v43 = vadd.f32 1.0, %v365_v40 }
  0xf1   :  { %v130_v46 = vmul.f32 %v128_v41, %v122_v44 }
  0xf2   :  { %v129_v45 = vmul.f32 %v127_v43, %v121_v42 }
  0xf4   :  { %319 = vmatprep.mubr.f32.mxu1 %v129_v45 }
  0xf5   :  { %320 = vmatmul.mubr.f32.vlgmr.msra.gmra.mrb[0].mxu1 %v130_v46 }
 0x1c8   :  { %v321_v48 = vpop.f32.mrb[0].mxu1 }
 0x1c9   :  { %v241_v49 = vadd.f32 %v321_v48, %v251_v47  ;;  %v215_v50 = vpop.f32.mrb[1].mxu1 }
 0x1ca   :  { %v240_v51 = vadd.f32 %v251_v47, %v215_v50 }
 0x1cb   :  { %243 = vst [vmem:[%s481_s5 + $0x8] sm:$0xff] %v241_v49 }
 0x1cc   :  { %242 = vst [vmem:[%s481_s5] sm:$0xff] %v240_v51 }

</bundles_post_ra>
